<compile_context>
chip_gen: v7x
topology: tpu7x:2x2x1
jax: 0.10.0
libtpu: 0.0.40
codegen_flags: <defaults>
</compile_context>

<pallas_src>
import functools

import jax
import jax.numpy as jnp
from jax.experimental import pallas as pl
from jax.experimental.pallas import tpu as pltpu


# ---------------------------------------------------------------------------
# Kernel: one Linear (x @ W + b) followed by LeakyReLU(negative_slope).
# Grid = (B//tb, N//tn, K//tk); K is the reduction axis (last, "arbitrary").
# ---------------------------------------------------------------------------
def _linear_lrelu_kernel(x_ref, w_ref, b_ref, o_ref, acc_ref, *, negative_slope):
    k = pl.program_id(2)

    @pl.when(k == 0)
    def _init():
        acc_ref[...] = jnp.zeros_like(acc_ref)

    # MXU matmul on the (tb, tk) x (tk, tn) tiles, f32 accumulation.
    acc_ref[...] += jnp.dot(x_ref[...], w_ref[...],
                            preferred_element_type=jnp.float32)

    @pl.when(k == pl.num_programs(2) - 1)
    def _finalize():
        z = acc_ref[...] + b_ref[...].astype(jnp.float32)   # (1, tn) broadcast
        # LeakyReLU(0.2): max(z, 0.2*z) is exact for slope in (0, 1).
        o_ref[...] = jnp.maximum(z, negative_slope * z).astype(o_ref.dtype)


def _pick_tile(dim, candidates):
    """Largest candidate tile that evenly divides `dim`, else the full dim."""
    for c in candidates:
        if dim >= c and dim % c == 0:
            return c
    return dim


def _linear_lrelu(x, w_t, b, *, negative_slope=0.2, tb=None, tn=None, tk=None):
    """x: [B, K]; w_t: [K, N] (already (in, out)); b: [N] or [1, N]."""
    B, K = x.shape
    K2, N = w_t.shape
    assert K == K2, (K, K2)

    tb = tb or _pick_tile(B, (256, 128, 64, 32, 16, 8))
    tn = tn or _pick_tile(N, (512, 256, 128))
    tk = tk or _pick_tile(K, (512, 256, 128))
    assert B % tb == 0 and N % tn == 0 and K % tk == 0, (B, N, K, tb, tn, tk)
    grid = (B // tb, N // tn, K // tk)

    b_row = b.reshape(1, N)

    # VMEM budget: double-buffered inputs/output + f32 accumulator, then an
    # explicit compiler limit (>= 32 MiB so big tiles pipeline on v5e/v6e,
    # capped at 48 MiB to stay under v7x's 64 MiB physical VMEM).
    est = (2 * tb * tk * x.dtype.itemsize          # x tiles
           + 2 * tk * tn * w_t.dtype.itemsize      # weight tiles
           + 2 * 1 * tn * b_row.dtype.itemsize     # bias tiles
           + 2 * tb * tn * x.dtype.itemsize        # output tiles
           + tb * tn * 4)                          # f32 accumulator
    vmem_limit = int(min(max(2 * est, 32 * 2**20), 48 * 2**20))

    kernel = functools.partial(_linear_lrelu_kernel,
                               negative_slope=negative_slope)

    return pl.pallas_call(
        kernel,
        out_shape=jax.ShapeDtypeStruct((B, N), x.dtype),
        grid_spec=pltpu.PrefetchScalarGridSpec(
            num_scalar_prefetch=0,
            grid=grid,
            in_specs=[
                pl.BlockSpec((tb, tk), lambda i, j, k: (i, k)),   # x
                pl.BlockSpec((tk, tn), lambda i, j, k: (k, j)),   # W (in, out)
                pl.BlockSpec((1, tn), lambda i, j, k: (0, j)),    # bias row
            ],
            out_specs=pl.BlockSpec((tb, tn), lambda i, j, k: (i, j)),
            scratch_shapes=[pltpu.VMEM((tb, tn), jnp.float32)],
        ),
        compiler_params=pltpu.CompilerParams(
            dimension_semantics=("parallel", "parallel", "arbitrary"),
            vmem_limit_bytes=vmem_limit,
        ),
    )(x, w_t, b_row)


# ---------------------------------------------------------------------------
# Module-level wrappers
# ---------------------------------------------------------------------------
def prepare_params(w1, b1, w2, b2, param_dtype=None):
    """One-time glue: torch (out,in) Linear weights -> (in,out); optional cast
    to a streaming dtype (e.g. bf16). Do this at init/update time, NOT per
    forward, so no HBM transpose of the biggest tensors on the hot path."""
    w1_t = jnp.transpose(w1)
    w2_t = jnp.transpose(w2)
    b1_r = b1.reshape(1, -1)
    b2_r = b2.reshape(1, -1)
    if param_dtype is not None:
        w1_t = w1_t.astype(param_dtype)
        w2_t = w2_t.astype(param_dtype)
        b1_r = b1_r.astype(param_dtype)
        b2_r = b2_r.astype(param_dtype)
    return w1_t, b1_r, w2_t, b2_r


def feedback_forward(x, w1_t, b1, w2_t, b2, *, tb=None, tn=None, tk=None):
    """Feedback.forward.  Returns (h, x1); torch returns h and stashes x1."""
    x1 = _linear_lrelu(x, w1_t, b1, tb=tb, tn=tn, tk=tk)
    h = _linear_lrelu(x1, w2_t, b2, tb=tb, tn=tn, tk=tk)
    return h, x1


def init_params(key, ngh):
    """weights_init: Linear weights ~ N(0, 0.02), biases = 0 (torch layout)."""
    k1, k2 = jax.random.split(key)
    w1 = 0.02 * jax.random.normal(k1, (ngh, ngh), jnp.float32)
    b1 = jnp.zeros((ngh,), jnp.float32)
    w2 = 0.02 * jax.random.normal(k2, (ngh, ngh), jnp.float32)
    b2 = jnp.zeros((ngh,), jnp.float32)
    return w1, b1, w2, b2


if __name__ == "__main__":
    NGH, B = 256, 16

    key = jax.random.PRNGKey(0)
    kx, kp = jax.random.split(key)
    x = jax.random.normal(kx, (B, NGH), jnp.float32)
    w1, b1, w2, b2 = init_params(kp, NGH)

    lrelu = lambda z: jnp.maximum(z, 0.2 * z)
    hp = jax.lax.Precision.HIGHEST

    # ---- f32 path; explicit small tiles to exercise the 2x2x2 grid + acc ----
    w1_t, b1_p, w2_t, b2_p = prepare_params(w1, b1, w2, b2)
    h, x1 = feedback_forward(x, w1_t, b1_p, w2_t, b2_p, tb=8, tn=128, tk=128)
    jax.block_until_ready((h, x1))

    x1_ref = lrelu(jnp.dot(x, w1.T, precision=hp) + b1)
    h_ref = lrelu(jnp.dot(x1_ref, w2.T, precision=hp) + b2)
    assert jnp.allclose(x1, x1_ref, atol=1e-4, rtol=1e-4)
    assert jnp.allclose(h, h_ref, atol=1e-4, rtol=1e-4)

    # ---- bf16 weight/activation streaming (f32 MXU accumulation) ----
    w1_tb, b1_b, w2_tb, b2_b = prepare_params(w1, b1, w2, b2,
                                              param_dtype=jnp.bfloat16)
    x_b = x.astype(jnp.bfloat16)
    h_b, x1_b = feedback_forward(x_b, w1_tb, b1_b, w2_tb, b2_b)
    jax.block_until_ready((h_b, x1_b))

    x1_bref = lrelu(jnp.dot(x_b.astype(jnp.float32), w1_tb.astype(jnp.float32),
                            precision=hp) + b1_b.astype(jnp.float32))
    x1_bref = x1_bref.astype(jnp.bfloat16)
    h_bref = lrelu(jnp.dot(x1_bref.astype(jnp.float32),
                           w2_tb.astype(jnp.float32), precision=hp)
                   + b2_b.astype(jnp.float32))
    assert jnp.allclose(h_b.astype(jnp.float32), h_bref, atol=2e-2, rtol=2e-2)

    print("KERNEL_OK")
</pallas_src>

<mosaic_0001>
module attributes {stable_mosaic.version = 11 : i64} {
  func.func @_linear_lrelu_kernel(%arg0: i32, %arg1: i32, %arg2: i32, %arg3: memref<8x128xf32, #tpu.memory_space<vmem>>, %arg4: memref<128x128xf32, #tpu.memory_space<vmem>>, %arg5: memref<1x128xf32, #tpu.memory_space<vmem>>, %arg6: memref<8x128xf32, #tpu.memory_space<vmem>>, %arg7: memref<8x128xf32, #tpu.memory_space<vmem>>) attributes {dimension_semantics = [#tpu.dimension_semantics<parallel>, #tpu.dimension_semantics<parallel>, #tpu.dimension_semantics<arbitrary>], iteration_bounds = array<i64: 2, 2, 2>, scalar_prefetch = 0 : i64, scratch_operands = 1 : i64, tpu.core_type = #tpu.core_type<tc>, window_params = [{transform_indices = @transform_0, window_bounds = array<i64: 8, 128>}, {transform_indices = @transform_1, window_bounds = array<i64: 128, 128>}, {transform_indices = @transform_2, window_bounds = array<i64: 1, 128>}, {transform_indices = @transform_3, window_bounds = array<i64: 8, 128>}]} {
    %c0_i32 = arith.constant 0 : i32
    %0 = arith.cmpi eq, %arg2, %c0_i32 : i32
    %1 = arith.extui %0 : i1 to i32
    %c0_i32_0 = arith.constant 0 : i32
    %2 = arith.cmpi ne, %1, %c0_i32_0 : i32
    scf.if %2 {
      %cst_9 = arith.constant 0.000000e+00 : f32
      %12 = vector.broadcast %cst_9 : f32 to vector<8x128xf32>
      %c0_10 = arith.constant 0 : index
      %c0_11 = arith.constant 0 : index
      %13 = vector.load %arg7[%c0_10, %c0_11] : memref<8x128xf32, #tpu.memory_space<vmem>>, vector<8x128xf32>
      tpu.vector_store %arg7[%c0_10, %c0_11], %12 {strides = array<i32>} : memref<8x128xf32, #tpu.memory_space<vmem>>, vector<8x128xf32>,
    } else {
    }
    %c0 = arith.constant 0 : index
    %c0_1 = arith.constant 0 : index
    %3 = vector.load %arg7[%c0, %c0_1] : memref<8x128xf32, #tpu.memory_space<vmem>>, vector<8x128xf32>
    %c0_2 = arith.constant 0 : index
    %c0_3 = arith.constant 0 : index
    %4 = vector.load %arg3[%c0_2, %c0_3] : memref<8x128xf32, #tpu.memory_space<vmem>>, vector<8x128xf32>
    %c0_4 = arith.constant 0 : index
    %c0_5 = arith.constant 0 : index
    %5 = vector.load %arg4[%c0_4, %c0_5] : memref<128x128xf32, #tpu.memory_space<vmem>>, vector<128x128xf32>
    %cst = arith.constant dense<0.000000e+00> : vector<8x128xf32>
    %6 = tpu.matmul %4, %5, %cst {dimension_numbers = #tpu.dot_dimension_numbers<[1], [0], [0], [1], [0, 0, 1, 1], [], []>} : vector<8x128xf32>, vector<128x128xf32>, vector<8x128xf32> -> vector<8x128xf32>
    %7 = arith.addf %3, %6 : vector<8x128xf32>
    %c0_6 = arith.constant 0 : index
    %c0_7 = arith.constant 0 : index
    %8 = vector.load %arg7[%c0_6, %c0_7] : memref<8x128xf32, #tpu.memory_space<vmem>>, vector<8x128xf32>
    tpu.vector_store %arg7[%c0_6, %c0_7], %7 {strides = array<i32>} : memref<8x128xf32, #tpu.memory_space<vmem>>, vector<8x128xf32>,
    %c1_i32 = arith.constant 1 : i32
    %9 = arith.cmpi eq, %arg2, %c1_i32 : i32
    %10 = arith.extui %9 : i1 to i32
    %c0_i32_8 = arith.constant 0 : i32
    %11 = arith.cmpi ne, %10, %c0_i32_8 : i32
    scf.if %11 {
      %c0_9 = arith.constant 0 : index
      %c0_10 = arith.constant 0 : index
      %12 = vector.load %arg7[%c0_9, %c0_10] : memref<8x128xf32, #tpu.memory_space<vmem>>, vector<8x128xf32>
      %c0_11 = arith.constant 0 : index
      %c0_12 = arith.constant 0 : index
      %13 = vector.load %arg5[%c0_11, %c0_12] : memref<1x128xf32, #tpu.memory_space<vmem>>, vector<1x128xf32>
      %14 = vector.broadcast %13 : vector<1x128xf32> to vector<8x128xf32>
      %15 = arith.addf %12, %14 : vector<8x128xf32>
      %cst_13 = arith.constant 2.000000e-01 : f32
      %16 = vector.broadcast %cst_13 : f32 to vector<8x128xf32>
      %17 = arith.mulf %16, %15 : vector<8x128xf32>
      %18 = arith.maximumf %15, %17 : vector<8x128xf32>
      %c0_14 = arith.constant 0 : index
      %c0_15 = arith.constant 0 : index
      %19 = vector.load %arg6[%c0_14, %c0_15] : memref<8x128xf32, #tpu.memory_space<vmem>>, vector<8x128xf32>
      tpu.vector_store %arg6[%c0_14, %c0_15], %18 {strides = array<i32>} : memref<8x128xf32, #tpu.memory_space<vmem>>, vector<8x128xf32>,
    } else {
    }
    return
  }
  func.func @transform_0(%arg0: i32, %arg1: i32, %arg2: i32) -> (i32, i32) {
    %c0_i32 = arith.constant 0 : i32
    return %arg0, %arg2 : i32, i32
  }
  func.func @transform_1(%arg0: i32, %arg1: i32, %arg2: i32) -> (i32, i32) {
    %c0_i32 = arith.constant 0 : i32
    return %arg2, %arg1 : i32, i32
  }
  func.func @transform_2(%arg0: i32, %arg1: i32, %arg2: i32) -> (i32, i32) {
    %c0_i32 = arith.constant 0 : i32
    %c0_i32_0 = arith.constant 0 : i32
    return %c0_i32, %arg1 : i32, i32
  }
  func.func @transform_3(%arg0: i32, %arg1: i32, %arg2: i32) -> (i32, i32) {
    %c0_i32 = arith.constant 0 : i32
    return %arg0, %arg1 : i32, i32
  }
}

</mosaic_0001>

<bundles_post_ra>
// kernel: tpu_custom_call.1
= control target key start
LH: loop header
LB: loop body
LE: loop exit
PB: predicated region body
PF: predicated region fallthrough
CT: control target
= control target key end

     0   :  { %s1442_s0 = inlined_call_operand.hbm [shape: f32[16,256], index: 0, kind: input, shape index: {}]   ;;  %s1443_s1 = inlined_call_operand.hbm [shape: f32[256,256], index: 1, kind: input, shape index: {}]   ;;  %s1444_s2 = inlined_call_operand.vmem [shape: f32[1,256], index: 2, kind: input, shape index: {}]   ;;  %s1445_s3 = inlined_call_operand.hbm [shape: f32[16,256], index: 3, kind: output, shape index: {}]  }
   0x1   :  { %1458 = sst [smem:[#allocation21_spill]] %s1442_s0 }
   0x2   :  { %1459 = sst [smem:[#allocation22_spill]] %s1445_s3 }
   0x3   :  { %8 = vsyncpa [#allocation4], 0 }
   0x4   :  { %10 = vsyncpa [#allocation4 + $0x1], 0 }
   0x5   :  { %11 = vsyncpa [#allocation7], 0 }
   0x6   :  { %13 = vsyncpa [#allocation7 + $0x1], 0 }
   0x7   :  { %14 = vsyncpa [#allocation5], 0 }
   0x8   :  { %16 = vsyncpa [#allocation5 + $0x1], 0  ;;  %s1034_s12 = smov 0   ;;  %s1036_s13 = smov 0  }
   0x9   :  { %s1038_s14 = smov 0   ;;  %s1040_s15 = smov 0  }
   0xa   :  { %s1042_s16 = smov 0   ;;  %s1044_s17 = smov 0  }
   0xb   :  { %s1046_s18 = smov 0   ;;  %s1048_s19 = smov 0  }
   0xc   :  { %s1050_s20 = smov 0   ;;  %s1052_s21 = smov 0  }
   0xd   :  { %s1054_s22 = smov 0   ;;  %s1056_s23 = smov 0  }
   0xe   :  { %s1058_s24 = smov 0   ;;  %s1060_s25 = smov 0  }
   0xf   :  { %s1062_s26 = smov 0   ;;  %s1064_s27 = smov 0  }
  0x10 LB: > { %1460 = sst [smem:[#allocation12_spill]] %s942_s12  ;;  %s1446_s28 = sadd.s32 4294967295, %s1002_s27   ;;  %s1002_s27 = sphi %s1064_s27, %s22_s27   ;;  %s998_s26 = sphi %s1062_s26, %s1514_s26   ;;  %s994_s25 = sphi %s1060_s25, %s1513_s25   ;;  %s990_s24 = sphi %s1058_s24, %s1512_s24   ;;  %s986_s23 = sphi %s1056_s23, %s1511_s23   ;;  %s982_s22 = sphi %s1054_s22, %s1510_s22   ;;  %s978_s21 = sphi %s1052_s21, %s1509_s21   ;;  %s974_s20 = sphi %s1050_s20, %s1508_s20   ;;  %s970_s19 = sphi %s1048_s19, %s1507_s19   ;;  %s966_s18 = sphi %s1046_s18, %s1506_s18   ;;  %s962_s17 = sphi %s1044_s17, %s1505_s17   ;;  %s958_s16 = sphi %s1042_s16, %s1504_s16   ;;  %s954_s15 = sphi %s1040_s15, %s1503_s15   ;;  %s950_s14 = sphi %s1038_s14, %s1502_s14   ;;  %s946_s13 = sphi %s1036_s13, %s1501_s13   ;;  %s942_s12 = sphi %s1034_s12, %s1499_s12  }
  0x11   : > { %1461 = sst [smem:[#allocation13_spill]] %s950_s14  ;;  %s34_s30 = sadd.s32 1, %s990_s24 }
  0x12   : > { %s37_s4 = sadd.s32 1, %s994_s25  ;;  %p35_p0 = scmp.ge.s32.totalorder %s34_s30, 2 }
  0x13   : > { %s41_s5 = sadd.s32 1, %s998_s26  ;;  %s50_s6 = sadd.s32 1, %s974_s20 }
  0x14   : > { %p57_p1 = scmp.ne.s32.totalorder %s974_s20, %s970_s19  ;;  %s1516_s30 = smov (%p35_p0, %s34_s30), 0 }
  0x15   : > { %1462 = sst [smem:[#allocation14_spill]] %s1516_s30  ;;  %s1518_s4 = smov (!%p35_p0, %s37_s4), %s994_s25 }
  0x16   : > { %s46_s7 = ssub.s32 %s990_s24, %s1516_s30  ;;  %p58_p2 = scmp.eq.s32.totalorder %s1002_s27, 0 }
  0x17   : > { %p39_p3 = scmp.ge.s32.totalorder %s1518_s4, 2  ;;  %p63_p4 = scmp.ne.s32.totalorder %s970_s19, %s966_s18 }
  0x18   : > { %p1129_p5 = por %p58_p2, %p57_p1  ;;  %p1135_p6 = scmp.eq.s32.totalorder %s1446_s28, 0 }
  0x19   : > { %s1520_s4 = smov (%p39_p3, %s1518_s4), 0  ;;  %s1522_s5 = smov (!%p39_p3, %s41_s5), %s998_s26 }
  0x1a   : > { %1465 = sst [smem:[#allocation15_spill]] %s1520_s4  ;;  %p1144_p7 = por %p1135_p6, %p63_p4 }
  0x1b   : > { %s74_s11 = ssub.s32 %s994_s25, %s1520_s4  ;;  %p43_p8 = scmp.ge.s32.totalorder %s1522_s5, 2 }
  0x1c   : > { %s1466_s10 = scalar_select %p1144_p7, 1, 0 }
  0x1d   : > { %s75_s18 = sor.u32 %s74_s11, %s46_s7  ;;  %s78_s29 = sadd.s32 1, %s962_s17 }
  0x1e   : > { %p76_p9 = scmp.eq.s32.totalorder %s75_s18, 0  ;;  %s1524_s5 = smov (%p43_p8, %s1522_s5), 0 }
  0x1f   : > { %1467 = sst [smem:[#allocation16_spill]] %s1524_s5  ;;  %s45_s30 = ssub.s32 %s998_s26, %s1524_s5 }
  0x20   : > { %s1154_s28 = scalar_select %p76_p9, %s962_s17, %s78_s29  }
  0x21   : > { %p85_p10 = scmp.ne.s32.totalorder %s962_s17, %s958_s16  ;;  %s47_s4 = sor.u32 %s46_s7, %s45_s30 }
  0x22   : > { %1468 = sst [smem:[#allocation17_spill]] %s1154_s28  ;;  %p91_p11 = scmp.ne.s32.totalorder %s958_s16, %s954_s15 }
  0x23   : > { %p48_p12 = scmp.eq.s32.totalorder %s47_s4, 0  ;;  %p1164_p13 = por %p85_p10, %p58_p2 }
  0x24   : > { %p1170_p0 = por %p91_p11, %p1135_p6  ;;  %s129_s5 = sor.u32 %s74_s11, %s45_s30 }
  0x25   : > { %s1175_s28 = scalar_select %p48_p12, %s974_s20, %s50_s6  }
  0x26   : > { %s1470_s29 = scalar_select %p1170_p0, 1, 0 }
  0x27   : > { %1471 = sst [smem:[#allocation18_spill]] %s1175_s28  ;;  %p130_p1 = scmp.eq.s32.totalorder %s129_s5, 0 }
  0x28   : > { %s132_s7 = sadd.s32 1, %s950_s14  ;;  %p142_p3 = scmp.ne.s32.totalorder %s950_s14, %s946_s13 }
  0x29   : > { %s1472_s15 = sadd.s32 4294967295, %s1002_s27   ;;  %p148_p6 = scmp.ne.s32.totalorder %s946_s13, %s942_s12 }
  0x2a   : > { %p143_p4 = scmp.eq.s32.totalorder %s1472_s15, 7  ;;  %s1476_s30 = sadd.s32 4294967294, %s1002_s27  }
  0x2b   : > { %s1183_s4 = scalar_select %p130_p1, %s950_s14, %s132_s7  }
  0x2c   : > { %p1185_p2 = por %p143_p4, %p142_p3  ;;  %p149_p8 = scmp.eq.s32.totalorder %s1476_s30, 7 }
  0x2d   : > { %1473 = sst [smem:[#allocation19_spill]] %s1183_s4  ;;  %p639_p9 = scmp.lt.s32.totalorder %s1002_s27, 8 }
  0x2e   : > { %s1474_s9 = scalar_select %p1185_p2, 1, 0 }
  0x2f   : > { %s169_s5 = sand.u32 1, %s974_s20   ;;  %p1195_p10 = por %p149_p8, %p148_p6 }
  0x30   : > { %1475 = sst [smem:[#allocation20_spill]] %s1474_s9  ;;  %s526_s11 = sshll.u32 %s169_s5, 3 }
  0x31   : > { %s1477_s6 = scalar_select %p1195_p10, 1, 0 }
  0x32   : > { %s527_s7 = sshll.u32 %s998_s26, 1  ;;  %s173_s4 = scalar_lea.vmem [#allocation3], %s526_s11 }
  0x33   : > { %s178_s15 = sadd.s32 %s990_s24, %s527_s7  ;;  %s182_s14 = sshll.u32 %s173_s4, 4  ;;  %s1206_s14 = int_to_ptr.vmem [resolvable:$true] %s182_s14 }
  0x34   : > { %s528_s28 = sshll.u32 %s178_s15, 7  ;;  %s1478_s0 = sld [smem:[#allocation21_spill]] }
  0x35   : > { %p1212_p11 = pnand %p639_p9, %p1129_p5  ;;  %s545_s4 = sshll.u32 %s990_s24, 5 }
  0x36   : > { %p1221_p12 = pnand %p639_p9, %p1164_p13 }
  0x37   : > { %p778_p6 = pneg %p1212_p11 }
  0x3a   : > { %s1204_s12 = scalar_lea.hbm %s1478_s0, %s528_s28  ;;  %s170_s28 = scalar_lea.sflag [#allocation4], %s169_s5 }
  0x3b   : > { %s776_s9 = scalar_lea.hbm %s1204_s12, 128  ;;  %s781_s18 = scalar_lea.hbm %s1478_s0, 512 }
  0x3c   : > { %p777_p4 = scmp.ne.s32.totalorder %s1204_s12, %s776_s9  ;;  %p782_p13 = scmp.lt.u32.totalorder %s1204_s12, %s1478_s0 }
  0x3d   : > { %p783_p9 = scmp.lt.u32.totalorder %s781_s18, %s776_s9  ;;  %p785_p3 = scmp.lt.u32.totalorder %s776_s9, %s1204_s12 }
  0x3e   : > { %p779_p5 = pnand %p778_p6, %p777_p4 }
  0x3f   : > { %p784_p1 = por %p783_p9, %p782_p13 }
  0x40   : > { %p780_p8 = pneg %p779_p5 }
  0x41   : > { %p786_p10 = por %p785_p3, %p784_p1 }
  0x43   : > { %p787_p2 = pnand %p786_p10, %p780_p8 }
  0x45   : > { %790 = shalt.err (!%p787_p2)
}
  0x46   : > { %s791_s5 = scalar_lea.vmem %s1206_s14, 128  ;;  %s1004_s8 = smov [#allocation3]  }
  0x47   : > { %p792_p4 = scmp.ne.s32.totalorder %s1206_s14, %s791_s5  ;;  %s796_s11 = sshll.u32 %s1004_s8, 4  ;;  %s797_s11 = int_to_ptr.vmem [resolvable:$false] %s796_s11 }
  0x48   : > { %s798_s7 = scalar_lea.vmem %s797_s11, 256  ;;  %p799_p7 = scmp.lt.s32.totalorder %s1206_s14, %s797_s11 }
  0x49   : > { %p794_p5 = pnand %p792_p4, %p778_p6  ;;  %p800_p13 = scmp.lt.s32.totalorder %s798_s7, %s791_s5 }
  0x4b   : > { %p795_p0 = pneg %p794_p5  ;;  %p801_p9 = por %p800_p13, %p799_p7 }
  0x4d   : > { %p802_p1 = pnand %p801_p9, %p795_p0 }
  0x4f   : > { %805 = shalt.err (!%p802_p1)
}
  0x50   : > { %631 = dma.hbm_to_vmem [thread:$0]  (!%p1212_p11), %s1204_s12, 128, %s1206_s14, %s170_s28  }
  0x51   : > { %p1481_p2 = scmp.lt.s32.totalorder %s1002_s27, 9  ;;  %p1482_p10 = scmp.ge.s32.totalorder %s1002_s27, 1 }
  0x52   : > { %s189_s18 = sand.u32 1, %s962_s17   ;;  %s199_s15 = sadd.s32 %s994_s25, %s545_s4 }
  0x53   : > { %p1256_p3 = pnand %p1482_p10, %p1481_p2  ;;  %s529_s30 = sshll.u32 %s189_s18, 7 }
  0x54   : > { %s532_s5 = sshll.u32 %s199_s15, 7  ;;  %s193_s12 = scalar_lea.vmem [#allocation6], %s529_s30 }
  0x55   : > { %s1267_s7 = scalar_lea.hbm %s1443_s1, %s532_s5  ;;  %s202_s14 = sshll.u32 %s193_s12, 4  ;;  %s1269_s14 = int_to_ptr.vmem [resolvable:$true] %s202_s14 }
  0x56   : > { %s1271_s28 = scalar_lea.sflag [#allocation7], %s189_s18  ;;  %s806_s0 = scalar_lea.hbm %s1267_s7, 2048 }
  0x57   : > { %p807_p7 = scmp.ne.s32.totalorder %s1267_s7, %s806_s0  ;;  %p808_p0 = pneg %p1221_p12 }
  0x58   : > { %s811_s5 = scalar_lea.hbm %s1443_s1, 8192  ;;  %p812_p8 = scmp.lt.u32.totalorder %s1267_s7, %s1443_s1 }
  0x59   : > { %p809_p11 = pnand %p808_p0, %p807_p7  ;;  %p813_p4 = scmp.lt.u32.totalorder %s811_s5, %s806_s0 }
  0x5a   : > { %p815_p13 = scmp.lt.u32.totalorder %s806_s0, %s1267_s7 }
  0x5b   : > { %p810_p6 = pneg %p809_p11  ;;  %p814_p5 = por %p813_p4, %p812_p8 }
  0x5d   : > { %p816_p9 = por %p815_p13, %p814_p5 }
  0x5f   : > { %p817_p1 = pnand %p816_p9, %p810_p6 }
  0x61   : > { %820 = shalt.err (!%p817_p1)
}
  0x62   : > { %s821_s18 = scalar_lea.vmem %s1269_s14, 2048  ;;  %s1005_s30 = smov [#allocation6]  }
  0x63   : > { %p822_p2 = scmp.ne.s32.totalorder %s1269_s14, %s821_s18  ;;  %s826_s12 = sshll.u32 %s1005_s30, 4  ;;  %s827_s12 = int_to_ptr.vmem [resolvable:$false] %s826_s12 }
  0x64   : > { %s828_s4 = scalar_lea.vmem %s827_s12, 4096  ;;  %p829_p11 = scmp.lt.s32.totalorder %s1269_s14, %s827_s12 }
  0x65   : > { %p824_p10 = pnand %p822_p2, %p808_p0  ;;  %p830_p8 = scmp.lt.s32.totalorder %s828_s4, %s821_s18 }
  0x67   : > { %p825_p7 = pneg %p824_p10  ;;  %p831_p4 = por %p830_p8, %p829_p11 }
  0x69   : > { %p832_p5 = pnand %p831_p4, %p825_p7 }
  0x6b   : > { %835 = shalt.err (!%p832_p5)
}
  0x6c   : > { %s1006_s0 = smov 256   ;;  %s1007_s15 = smov 128  }
  0x6d   : > { %s1008_s5 = smov 8   ;;  %220 = sbr.rel (%p1256_p3) target bundleno = 421 (0x1a5), region = 32 }
  0x6e   : > { %634 = dma.hbm_to_vmem [thread:$0]  (!%p1221_p12), %s1267_s7, 2048, %s1269_s14, %s1271_s28, %s1006_s0, %s1007_s15, %s1008_s5  }
  0x6f   : > { %s222_s8 = sand.u32 (!%p1256_p3), 1, %s970_s19   ;;  %p1484_p0 = scmp.ne.s32.totalorder (!%p1256_p3), %s1466_s10, 0 }
  0x70   : > { %s1302_s11 = sshll.u32 (!%p1256_p3), %s222_s8, 3  ;;  %s223_s18 = scalar_lea.sflag (!%p1256_p3), [#allocation4], %s222_s8 }
  0x71   : > { %s226_s30 = scalar_lea.vmem (!%p1256_p3), [#allocation3], %s1302_s11 }
  0x74   : > { %929 = dma.done.wait (%p1484_p0), %s223_s18, 128  }
  0x75   : > { %931 = vsyncadd (%p1484_p0), %s223_s18, 4294967168  ;;  %s231_s3 = sand.u32 1, %s958_s16   ;;  %p1485_p12 = scmp.ne.s32.totalorder %s1470_s29, 0 }
  0x76   : > { %s535_s7 = sshll.u32 %s231_s3, 7  ;;  %s232_s14 = scalar_lea.sflag [#allocation7], %s231_s3 }
  0x77   : > { %s1310_s9 = scalar_lea.vmem [#allocation6], %s535_s7 }
  0x78   : > { %933 = dma.done.wait (%p1485_p12), %s232_s14, 2048  }
  0x79   : > { %935 = vsyncadd (%p1485_p12), %s232_s14, 4294965248  ;;  %s263_s28 = sand.u32 1, %s946_s13   ;;  %p267_p3 = scmp.lt.s32.totalorder %s982_s22, 1 }
  0x7a   : > { %s1320_s10 = sshll.u32 %s263_s28, 3  ;;  %p537_p6 = scmp.ne.s32.totalorder %s978_s21, 0 }
  0x7b   : > { %s1323_s12 = scalar_select %p267_p3, %s982_s22, 1 }
  0x7c   : > { %s265_s5 = scalar_lea.vmem [#allocation8], %s1320_s10  ;;  %273 = sbr.rel (%p537_p6) target bundleno = 131 (0x83), region = 44  ;;  %v1009_v0 = vmov (!%p537_p6), 0.0  }
  0x7d   : > { %s269_s15 = scalar_lea.vmem %s1444_s2, %s1323_s12  ;;  %274 = vst [vmem:[#allocation2] sm:$0xff] (!%p537_p6), %v1009_v0 }
  0x83 PF: > { %v277_v1 = vld [vmem:[%s1310_s9] sm:$0xff]  ;;  %v278_v2 = vld [vmem:[%s1310_s9 + $0x8] sm:$0xff]  ;;  %v279_v3 = vld [vmem:[%s1310_s9 + $0x10] sm:$0xff]  ;;  %v1010_v4 = vmov 0.0|0.0   ;;  %vm1011_vm0 = vmmov 0   ;;  %v1012_v7 = vmov 0.0  }
  0x84   : > { %598 = vmatprep.subr.bf16.mxu0 %v1010_v4  ;;  %v599_v5 = vpack.c.bf16 %v278_v2, %v277_v1  ;;  %v280_v6 = vld [vmem:[%s1310_s9 + $0x18] sm:$0xff]  ;;  %595 = vmatprep.mubr.msk.f32.mxu0 %vm1011_vm0, %v1012_v7  ;;  %v281_v9 = vld [vmem:[%s1310_s9 + $0x20] sm:$0xff]  ;;  %v282_v10 = vld [vmem:[%s1310_s9 + $0x28] sm:$0xff]  ;;  %p538_p13 = scmp.ne.s32.totalorder %s978_s21, 1 }
  0x85   : > { %v602_v8 = vpack.c.bf16 %v280_v6, %v279_v3  ;;  %v605_v11 = vpack.c.bf16 %v282_v10, %v281_v9  ;;  %v283_v12 = vld [vmem:[%s1310_s9 + $0x30] sm:$0xff]  ;;  %v284_v13 = vld [vmem:[%s1310_s9 + $0x38] sm:$0xff]  ;;  %v285_v15 = vld [vmem:[%s1310_s9 + $0x40] sm:$0xff] }
  0x86   : > { %600 = vmatpush3.bf16.msra.mxu0 %v599_v5  ;;  %v608_v14 = vpack.c.bf16 %v284_v13, %v283_v12  ;;  %v286_v16 = vld [vmem:[%s1310_s9 + $0x48] sm:$0xff]  ;;  %v287_v18 = vld [vmem:[%s1310_s9 + $0x50] sm:$0xff]  ;;  %v288_v19 = vld [vmem:[%s1310_s9 + $0x58] sm:$0xff] }
  0x87   : > { %601 = vmatprep.subr.bf16.mxu0 %v1010_v4  ;;  %v611_v17 = vpack.c.bf16 %v286_v16, %v285_v15  ;;  %v614_v20 = vpack.c.bf16 %v288_v19, %v287_v18  ;;  %v289_v21 = vld [vmem:[%s1310_s9 + $0x60] sm:$0xff]  ;;  %v290_v22 = vld [vmem:[%s1310_s9 + $0x68] sm:$0xff]  ;;  %v291_v24 = vld [vmem:[%s1310_s9 + $0x70] sm:$0xff] }
  0x88   : > { %v617_v23 = vpack.c.bf16 %v290_v22, %v289_v21  ;;  %v292_v25 = vld [vmem:[%s1310_s9 + $0x78] sm:$0xff]  ;;  %v275_v28 = vld [vmem:[#allocation2] sm:$0xff] }
  0x89   : > { %v620_v26 = vpack.c.bf16 %v292_v25, %v291_v24  ;;  %v276_v27 = vld [vmem:[%s226_s30] sm:$0xff]  ;;  %v539_v33 = vld [vmem:[%s269_s15] ss:$0 sm:$0xff] (!%p538_p13) }
  0x8a   : > { %603 = vmatpush3.bf16.msra.mxu0 %v602_v8 }
  0x8b   : > { %604 = vmatprep.subr.bf16.mxu0 %v1010_v4 }
  0x8e   : > { %606 = vmatpush3.bf16.msra.mxu0 %v605_v11 }
  0x8f   : > { %607 = vmatprep.subr.bf16.mxu0 %v1010_v4 }
  0x92   : > { %609 = vmatpush3.bf16.msra.mxu0 %v608_v14 }
  0x93   : > { %610 = vmatprep.subr.bf16.mxu0 %v1010_v4 }
  0x96   : > { %612 = vmatpush3.bf16.msra.mxu0 %v611_v17 }
  0x97   : > { %613 = vmatprep.subr.bf16.mxu0 %v1010_v4 }
  0x9a   : > { %615 = vmatpush3.bf16.msra.mxu0 %v614_v20 }
  0x9b   : > { %616 = vmatprep.subr.bf16.mxu0 %v1010_v4 }
  0x9e   : > { %618 = vmatpush3.bf16.msra.mxu0 %v617_v23 }
  0x9f   : > { %619 = vmatprep.subr.bf16.mxu0 %v1010_v4 }
  0xa2   : > { %621 = vmatpush3.bf16.msra.mxu0 %v620_v26 }
  0xa5   : > { %596 = vmatmul.mubr.f32.vlgmr.msra.gmra.mrb[0].mxu0 %v276_v27 }
 0x175   : > { %368 = sbr.rel (%p538_p13) target bundleno = 394 (0x18a), region = 48 }
 0x178   : > { %v359_v29 = vpop.f32.mrb[0].mxu0 }
 0x179   : > { %v363_v30 = vadd.f32 %v359_v29, %v275_v28  ;;  %v597_v31 = vpop.f32.mrb[1].mxu0 }
 0x17b   : > { %364 = vst [vmem:[#allocation2] sm:$0xff] %v363_v30 }
 0x182   : > { %v369_v32 = vld [vmem:[#allocation2] sm:$0xff] }
 0x183   : > { %v377_v34 = vadd.f32 %v539_v33, %v369_v32 }
 0x185   : > { %v378_v35 = vmul.f32 0.2, %v377_v34 }
 0x187   : > { %v379_v36 = vmax.f32 %v377_v34, %v378_v35 }
 0x189   : > { %380 = vst [vmem:[%s265_s5] sm:$0xff] %v379_v36 }
 0x18a PF: > { %s1486_s21 = sld [smem:[#allocation20_spill]]  ;;  %s541_s11 = sshll.u32 %s986_s23, 1 }
 0x18b   : > { %s393_s18 = sadd.s32 %s982_s22, %s541_s11  ;;  %s397_s30 = sshll.u32 %s265_s5, 4  ;;  %s1361_s30 = int_to_ptr.vmem [resolvable:$true] %s397_s30 }
 0x18c   : > { %s542_s3 = sshll.u32 %s393_s18, 7  ;;  %s1487_s9 = sld [smem:[#allocation22_spill]] }
 0x18d   : > { %s382_s4 = scalar_lea.sflag [#allocation5], %s263_s28  ;;  %s836_s0 = scalar_lea.vmem %s1361_s30, 128 }
 0x18e   : > { %p837_p9 = scmp.ne.s32.totalorder %s1361_s30, %s836_s0  ;;  %s1013_s22 = smov [#allocation8]  }
 0x18f   : > { %s840_s23 = sshll.u32 %s1013_s22, 4  ;;  %s841_s23 = int_to_ptr.vmem [resolvable:$false] %s840_s23 }
 0x190   : > { %p1488_p1 = scmp.ne.s32.totalorder %s1486_s21, 0  ;;  %s842_s10 = scalar_lea.vmem %s841_s23, 256 }
 0x191   : > { %p843_p7 = scmp.lt.s32.totalorder %s1361_s30, %s841_s23  ;;  %p844_p11 = scmp.lt.s32.totalorder %s842_s10, %s836_s0 }
 0x192   : > { %s395_s12 = scalar_lea.hbm %s1487_s9, %s542_s3  ;;  %p838_p2 = pnand %p837_p9, %p1488_p1 }
 0x193   : > { %p845_p8 = por %p844_p11, %p843_p7 }
 0x194   : > { %p839_p10 = pneg %p838_p2 }
 0x196   : > { %p846_p4 = pnand %p845_p8, %p839_p10 }
 0x198   : > { %849 = shalt.err (!%p846_p4)
}
 0x199   : > { %s850_s15 = scalar_lea.hbm %s395_s12, 128  ;;  %s854_s29 = scalar_lea.hbm %s1487_s9, 512 }
 0x19a   : > { %p851_p5 = scmp.ne.s32.totalorder %s395_s12, %s850_s15  ;;  %p855_p3 = scmp.lt.u32.totalorder %s395_s12, %s1487_s9 }
 0x19b   : > { %p856_p6 = scmp.lt.u32.totalorder %s854_s29, %s850_s15  ;;  %p858_p9 = scmp.lt.u32.totalorder %s850_s15, %s395_s12 }
 0x19c   : > { %p852_p0 = pnand %p851_p5, %p1488_p1 }
 0x19d   : > { %p857_p13 = por %p856_p6, %p855_p3 }
 0x19e   : > { %p853_p12 = pneg %p852_p0 }
 0x19f   : > { %p859_p2 = por %p858_p9, %p857_p13 }
 0x1a1   : > { %p860_p10 = pnand %p859_p2, %p853_p12 }
 0x1a3   : > { %863 = shalt.err (!%p860_p10)
}
 0x1a4   : > { %626 = dma.vmem_to_hbm [thread:$0]  (%p1488_p1), %s1361_s30, 128, %s395_s12, %s382_s4  }
 0x1a5 PF: > { %s1489_s18 = sld [smem:[#allocation12_spill]]  ;;  %p640_p7 = scmp.ge.s32.totalorder %s1002_s27, 2 }
 0x1a6   : > { %p1490_p11 = scmp.ne.s32.totalorder %s1477_s6, 0 }
 0x1a8   : > { %p636_p8 = pnand %p640_p7, %p1490_p11 }
 0x1ab   : > { %s409_s3 = sand.u32 1, %s1489_s18  }
 0x1ac   : > { %s410_s7 = scalar_lea.sflag [#allocation5], %s409_s3 }
 0x1ad   : > { %937 = dma.done.wait (!%p636_p8), %s410_s7, 128  }
 0x1ae   : > { %939 = vsyncadd (!%p636_p8), %s410_s7, 4294967168  ;;  %s22_s27 = sadd.s32 1, %s1002_s27   ;;  %s1492_s21 = sld [smem:[#allocation13_spill]] }
 0x1af   : > { %p1389_p4 = scmp.ge.s32.totalorder %s22_s27, 10   ;;  %s1493_s30 = sld [smem:[#allocation19_spill]] }
 0x1b0   : > { %s1494_s4 = sld [smem:[#allocation17_spill]]  ;;  %s1495_s0 = sld [smem:[#allocation18_spill]] }
 0x1b1   : > { %s1496_s6 = sld [smem:[#allocation14_spill]]  ;;  %s1497_s10 = sld [smem:[#allocation15_spill]] }
 0x1b2   : > { %s1498_s28 = sld [smem:[#allocation16_spill]]  ;;  %s1499_s12 = smov %s946_s13 }
 0x1b3   : > { %s1503_s15 = smov %s958_s16  ;;  %s1504_s16 = smov %s962_s17 }
 0x1b4   : > { %s1501_s13 = smov %s1492_s21  ;;  %s1506_s18 = smov %s970_s19 }
 0x1b5   : > { %s1502_s14 = smov %s1493_s30  ;;  %s1507_s19 = smov %s974_s20 }
 0x1b6   : > { %s1505_s17 = smov %s1494_s4  ;;  %s1508_s20 = smov %s1495_s0 }
 0x1b7   : > { %s1509_s21 = smov %s990_s24  ;;  %s1510_s22 = smov %s994_s25 }
 0x1b8   : > { %s1511_s23 = smov %s998_s26  ;;  %s1512_s24 = smov %s1496_s6 }
 0x1b9   : > { %s1513_s25 = smov %s1497_s10  ;;  %s1514_s26 = smov %s1498_s28 }
 0x1ba   :  { %21 = sbr.rel (!%p1389_p4) target bundleno = 16 (0x10), region = 101 }
 0x1c1   :  { %415 = vsyncpa [#allocation4], 1 }
 0x1c2   :  { %417 = vsyncpa [#allocation4 + $0x1], 1 }
 0x1c3   :  { %418 = vsyncpa [#allocation7], 1 }
 0x1c4   :  { %420 = vsyncpa [#allocation7 + $0x1], 1 }
 0x1c5   :  { %421 = vsyncpa [#allocation5], 1 }
 0x1c6   :  { %423 = vsyncpa [#allocation5 + $0x1], 1 }

</bundles_post_ra>
